<compile_context>
chip_gen: v6e
topology: v6e:2x2x1
jax: 0.10.0
libtpu: 0.0.40
codegen_flags: <defaults>
</compile_context>

<pallas_src>
import functools
import math

import jax
import jax.numpy as jnp
from jax.experimental import pallas as pl
from jax.experimental.pallas import tpu as pltpu


_MAX_B_TILE = 1024          # max planes per grid step


def _round_up(x: int, m: int) -> int:
    return ((x + m - 1) // m) * m


def _device_params():
    """Returns (vmem_bytes, num_tensorcores, peak_bf16_flops, peak_f32_flops, hbm_bw)."""
    vmem = 64 * 1024 * 1024            # conservative default (v7x per-TC VMEM)
    try:
        vmem = int(pltpu.get_tpu_info().vmem_capacity_bytes)
    except Exception:
        pass
    kind = ""
    try:
        kind = jax.devices()[0].device_kind.lower()
    except Exception:
        pass
    if "v5 lite" in kind or "v5e" in kind or "v5lite" in kind:
        return vmem, 1, 197e12, 50e12, 0.82e12
    if "v6" in kind:
        return vmem, 1, 918e12, 230e12, 1.4e12
    if "7" in kind:                    # v7x: 2 TCs per chip sharing ~3.2 TB/s HBM
        return vmem, 2, 996e12, 250e12, 1.6e12
    if "v4" in kind or "v5" in kind:   # v4 / v5p megacore parts
        return vmem, 2, 275e12, 70e12, 1.2e12
    return vmem, 1, 200e12, 50e12, 0.8e12


def _vmem_limit(vmem_cap: int, vmem_need: int) -> int:
    limit = max(int(vmem_need) + (8 << 20), 32 << 20)
    return int(min(vmem_cap * 9 // 10, limit))


def _choose_tiling(nc: int, bmax: int, row_align: int, num_tc: int):
    """Pick (b_tile, nc_pad, steps).

    Prefers: (a) no padded copy of the (bandwidth-bound) input/output, (b) the
    largest tile that fits the VMEM budget, (c) a step count that is a multiple of
    the TensorCore count when every step still keeps >= 256 rows.
    """
    bmax = max(row_align, min(int(bmax), _MAX_B_TILE))
    bmax_al = max(row_align, (bmax // row_align) * row_align)

    if nc <= bmax:
        # Whole problem fits in one block; split only if each step keeps >=256 rows
        # (MXU stays full, fixed per-step overhead negligible) and the split is exact.
        for s in (4 * num_tc, 2 * num_tc, num_tc, 2):
            if s > 1 and nc % (s * row_align) == 0 and nc // s >= 256:
                return nc // s, nc, s
        return nc, nc, 1

    # Multiple steps required: prefer an aligned tile that divides nc exactly so no
    # padded copy of the input/output is ever materialized in HBM.
    if nc % row_align == 0:
        divisors = [d for d in range(row_align, bmax_al + 1, row_align)
                    if nc % d == 0]
        if divisors:
            best = max(divisors)
            if num_tc > 1 and (nc // best) % num_tc != 0:
                even = [d for d in divisors
                        if (nc // d) % num_tc == 0 and 2 * d >= best]
                if even:
                    best = max(even)
            if best >= min(64, bmax_al):
                return best, nc, nc // best

    # Fall back to minimal zero padding of the plane axis.
    steps = -(-nc // bmax_al)
    if num_tc > 1:
        steps = _round_up(steps, num_tc)
    b_tile = _round_up(-(-nc // steps), row_align)
    nc_pad = b_tile * steps
    return b_tile, nc_pad, steps


def _interp_matrix(out_size: int, in_size: int) -> jnp.ndarray:
    """Row-stochastic [out_size, in_size] bilinear matrix, align_corners=False."""
    scale = in_size / out_size
    dst = jnp.arange(out_size, dtype=jnp.float32)
    src = (dst + 0.5) * scale - 0.5
    # PyTorch clamps negative source coords to 0 (align_corners=False, non-cubic).
    src = jnp.maximum(src, 0.0)
    i0 = jnp.clip(jnp.floor(src).astype(jnp.int32), 0, in_size - 1)
    i1 = jnp.minimum(i0 + 1, in_size - 1)
    w1 = src - i0.astype(jnp.float32)
    w0 = 1.0 - w1
    oh0 = jax.nn.one_hot(i0, in_size, dtype=jnp.float32)
    oh1 = jax.nn.one_hot(i1, in_size, dtype=jnp.float32)
    return w0[:, None] * oh0 + w1[:, None] * oh1


# ---------------------------------------------------------------------------
# Kernels
# ---------------------------------------------------------------------------

def _kron_kernel(w_ref, x_ref, o_ref):
    """out = x_flat @ kron(Wy, Wx)^T for one block of flattened planes.

    w_ref: (K, M) VMEM-resident weight (single copy, K = H_in*W_in, M = H_out*W_out)
    x_ref: (B_TILE, K)      o_ref: (B_TILE, M)   (lane-dense rows)
    """
    x = x_ref[...]
    w = w_ref[...]
    if x.dtype != w.dtype:
        x = x.astype(w.dtype)
    o_ref[...] = jnp.dot(x, w, preferred_element_type=jnp.float32).astype(o_ref.dtype)


def _separable_kernel(wyt_ref, wxt_ref, x_ref, o_ref):
    """Two batched lane-dense matmuls over a whole block of planes.

    wyt_ref: (H_in, H_out)   Wy^T, VMEM-resident
    wxt_ref: (W_in, W_out)   Wx^T, VMEM-resident
    x_ref:   (B_TILE*H_in, W_in)   raw planes, row-major (free reshape of NCHW)
    o_ref:   (B_TILE*H_out, W_out) rows come out directly in (h_out, w_out) order
    """
    h_in, h_out = wyt_ref.shape
    w_in, _ = wxt_ref.shape
    b = x_ref.shape[0] // h_in

    wyt = wyt_ref[...]
    wxt = wxt_ref[...]
    x = x_ref[...]
    if x.dtype != wyt.dtype:
        x = x.astype(wyt.dtype)

    # Put the height-contraction dim minor: (b, h_in, w_in) -> (b*w_in, h_in).
    xt = jnp.swapaxes(x.reshape(b, h_in, w_in), 1, 2).reshape(b * w_in, h_in)
    # Height pass: one (B*W_in, H_in) @ (H_in, H_out) MXU matmul.
    t = jnp.dot(xt, wyt, preferred_element_type=jnp.float32)
    # Put the width-contraction dim minor: (b, w_in, h_out) -> (b*h_out, w_in).
    t = jnp.swapaxes(t.reshape(b, w_in, h_out), 1, 2).reshape(b * h_out, w_in)
    t = t.astype(wxt.dtype)
    # Width pass: one (B*H_out, W_in) @ (W_in, W_out) matmul; rows store directly
    # into the final (h_out, w_out) order.
    o_ref[...] = jnp.dot(t, wxt,
                         preferred_element_type=jnp.float32).astype(o_ref.dtype)


# ---------------------------------------------------------------------------
# Wrapper
# ---------------------------------------------------------------------------

@functools.partial(jax.jit, static_argnames=("size", "force_separable", "force_kron"))
def interpolate_bilinear(x: jnp.ndarray, size,
                         force_separable: bool = False,
                         force_kron: bool = False):
    """F.interpolate(x, size=size, mode='bilinear', align_corners=False), NCHW."""
    n, c, h_in, w_in = x.shape
    h_out, w_out = size
    nc = n * c
    k = h_in * w_in
    m = h_out * w_out

    io_bytes = jnp.dtype(x.dtype).itemsize
    # bf16 inputs keep bf16 MXU operands (f32 accumulation); interpolation weights
    # are rounded to bf16 in that case (small, documented deviation from PyTorch).
    op_dtype = jnp.bfloat16 if x.dtype == jnp.bfloat16 else jnp.float32
    op_bytes = jnp.dtype(op_dtype).itemsize
    row_align = 16 if op_dtype == jnp.bfloat16 else 8

    vmem_cap, num_tc, peak_bf16, peak_f32, hbm_bw = _device_params()
    peak = peak_bf16 if op_dtype == jnp.bfloat16 else peak_f32
    budget = vmem_cap // 2

    wy = _interp_matrix(h_out, h_in)          # (H_out, H_in), f32
    wx = _interp_matrix(w_out, w_in)          # (W_out, W_in), f32

    # ---- Roofline-aware path selection (per generation and per dtype).
    kron_w_bytes = k * m * op_bytes
    weight_fits = kron_w_bytes <= max(vmem_cap // 8, 2 << 20)
    io_time = (nc * (k + m) * io_bytes + kron_w_bytes) / hbm_bw
    kron_time = max(io_time, 2.0 * nc * k * m / peak)
    sep_flops = 2.0 * nc * (w_in * h_in * h_out + h_out * w_in * w_out)
    sep_time = 1.15 * max(io_time, sep_flops / peak)   # transpose/relayout overhead
    use_kron = weight_fits and kron_time <= sep_time
    if force_separable:
        use_kron = False
    elif force_kron:
        use_kron = True

    if use_kron:
        # Fused path: one lane-dense MXU matmul per plane block.
        w_t = jnp.kron(wy, wx).T.astype(op_dtype)                  # (K, M)
        per_row = 2 * (k + m) * io_bytes + (k + m) * op_bytes + 4 * m
        bmax = max(row_align, (budget - kron_w_bytes) // per_row)
        b_tile, nc_pad, steps = _choose_tiling(nc, bmax, row_align, num_tc)

        x_flat = x.reshape(nc, k)
        if nc_pad != nc:
            x_flat = jnp.pad(x_flat, ((0, nc_pad - nc), (0, 0)))

        vmem_need = kron_w_bytes + per_row * b_tile
        cost = pl.CostEstimate(
            flops=int(2 * nc_pad * k * m),
            transcendentals=0,
            bytes_accessed=int(nc_pad * (k + m) * io_bytes + kron_w_bytes),
        )
        out = pl.pallas_call(
            _kron_kernel,
            out_shape=jax.ShapeDtypeStruct((nc_pad, m), x.dtype),
            grid_spec=pltpu.PrefetchScalarGridSpec(
                num_scalar_prefetch=0,
                grid=(steps,),
                in_specs=[
                    # Grid-invariant weight: one VMEM-resident copy, no
                    # double-buffering, no per-step re-DMA.
                    pl.BlockSpec(memory_space=pltpu.MemorySpace.VMEM),
                    pl.BlockSpec((b_tile, k), lambda b: (b, 0)),
                ],
                out_specs=pl.BlockSpec((b_tile, m), lambda b: (b, 0)),
            ),
            compiler_params=pltpu.CompilerParams(
                dimension_semantics=("parallel",),
                vmem_limit_bytes=_vmem_limit(vmem_cap, vmem_need),
            ),
            cost_estimate=cost,
        )(w_t, x_flat)
        if nc_pad != nc:
            out = out[:nc]
        return out.reshape(n, c, h_out, w_out)

    # ---- Separable path (large spatial sizes / compute-bound kron cases).
    wyt_op = wy.T.astype(op_dtype)                                 # (H_in, H_out)
    wxt_op = wx.T.astype(op_dtype)                                 # (W_in, W_out)
    sep_w_bytes = int((wyt_op.size + wxt_op.size)) * op_bytes
    s_mid = w_in * h_out
    per_row = (2 * (k + m) * io_bytes + 2 * k * op_bytes
               + (2 * s_mid + m) * 4 + s_mid * op_bytes)
    bmax = max(row_align, (budget - sep_w_bytes) // per_row)
    b_tile, nc_pad, steps = _choose_tiling(nc, bmax, row_align, num_tc)

    x2 = x.reshape(nc * h_in, w_in)                                # free reshape
    if nc_pad != nc:
        x2 = jnp.pad(x2, ((0, (nc_pad - nc) * h_in), (0, 0)))

    vmem_need = sep_w_bytes + per_row * b_tile
    cost = pl.CostEstimate(
        flops=int(2 * nc_pad * (w_in * h_in * h_out + h_out * w_in * w_out)),
        transcendentals=0,
        bytes_accessed=int(nc_pad * (k + m) * io_bytes + sep_w_bytes),
    )
    out = pl.pallas_call(
        _separable_kernel,
        out_shape=jax.ShapeDtypeStruct((nc_pad * h_out, w_out), x.dtype),
        grid_spec=pltpu.PrefetchScalarGridSpec(
            num_scalar_prefetch=0,
            grid=(steps,),
            in_specs=[
                pl.BlockSpec(memory_space=pltpu.MemorySpace.VMEM),   # Wy^T resident
                pl.BlockSpec(memory_space=pltpu.MemorySpace.VMEM),   # Wx^T resident
                pl.BlockSpec((b_tile * h_in, w_in), lambda b: (b, 0)),
            ],
            out_specs=pl.BlockSpec((b_tile * h_out, w_out), lambda b: (b, 0)),
        ),
        compiler_params=pltpu.CompilerParams(
            dimension_semantics=("parallel",),
            vmem_limit_bytes=_vmem_limit(vmem_cap, vmem_need),
        ),
        cost_estimate=cost,
    )(wyt_op, wxt_op, x2)
    if nc_pad != nc:
        out = out[: nc * h_out]
    return out.reshape(n, c, h_out, w_out)


class Interpolate:
    """Forward-pass analogue of the PyTorch Interpolate module (bilinear only)."""

    def __init__(self, size=None, scale_factor=None, mode="bilinear",
                 align_corners=None):
        if mode != "bilinear":
            # TODO(synk): only mode='bilinear' (the mode used by models/yolov3.py)
            # is implemented as a Pallas kernel.
            raise NotImplementedError("only mode='bilinear' is implemented")
        self.size = size
        self.scale_factor = scale_factor

    def __call__(self, x):
        size = self.size
        if size is None:
            sf = self.scale_factor
            sfh, sfw = (sf, sf) if not isinstance(sf, (tuple, list)) else sf
            size = (int(math.floor(x.shape[2] * sfh)),
                    int(math.floor(x.shape[3] * sfw)))
        elif not isinstance(size, (tuple, list)):
            size = (int(size), int(size))
        # forward() always passes align_corners=False, matching the module.
        return interpolate_bilinear(x, tuple(size))


# ---------------------------------------------------------------------------
# Pure-JAX reference (PyTorch bilinear, align_corners=False, NCHW)
# ---------------------------------------------------------------------------

def _reference_bilinear(x: jnp.ndarray, size) -> jnp.ndarray:
    n, c, h_in, w_in = x.shape
    h_out, w_out = size
    xf = x.astype(jnp.float32)

    def coords(out_size, in_size):
        scale = in_size / out_size
        src = jnp.maximum(
            (jnp.arange(out_size, dtype=jnp.float32) + 0.5) * scale - 0.5, 0.0)
        i0 = jnp.clip(jnp.floor(src).astype(jnp.int32), 0, in_size - 1)
        i1 = jnp.minimum(i0 + 1, in_size - 1)
        w1 = src - i0.astype(jnp.float32)
        return i0, i1, w1

    y0, y1, wy1 = coords(h_out, h_in)
    x0, x1, wx1 = coords(w_out, w_in)
    wy1 = wy1[:, None]
    wx1 = wx1[None, :]

    def gather(iy, ix):
        return xf[:, :, iy, :][:, :, :, ix]

    top = gather(y0, x0) * (1 - wx1) + gather(y0, x1) * wx1
    bot = gather(y1, x0) * (1 - wx1) + gather(y1, x1) * wx1
    out = top * (1 - wy1) + bot * wy1
    return out.astype(x.dtype)


if __name__ == "__main__":
    key = jax.random.PRNGKey(0)
    k0, k1 = jax.random.split(key)

    # Primary check: 2x bilinear upsample, NCHW, f32 (roofline-selected path).
    N, C, H, W = 2, 4, 16, 16
    size = (32, 32)
    x = jax.random.normal(k0, (N, C, H, W), dtype=jnp.float32)
    y_ref = _reference_bilinear(x, size)

    y = jax.block_until_ready(interpolate_bilinear(x, size))
    assert y.shape == (N, C, size[0], size[1])
    assert jnp.allclose(y, y_ref, atol=1e-4, rtol=1e-4), "auto path mismatch"

    # Both kernels exercised explicitly regardless of which chip this runs on.
    y_sep = jax.block_until_ready(interpolate_bilinear(x, size, force_separable=True))
    assert jnp.allclose(y_sep, y_ref, atol=1e-4, rtol=1e-4), "separable path mismatch"

    y_kr = jax.block_until_ready(interpolate_bilinear(x, size, force_kron=True))
    assert jnp.allclose(y_kr, y_ref, atol=1e-4, rtol=1e-4), "kron path mismatch"

    # Odd spatial size + non-multiple-of-8 plane count (YOLOv3 13x13 -> 26x26);
    # fused path handles arbitrary sizes (no wrapper pad is materialized).
    x2 = jax.random.normal(k1, (1, 3, 13, 13), dtype=jnp.float32)
    y2 = jax.block_until_ready(interpolate_bilinear(x2, (26, 26), force_kron=True))
    y2_ref = _reference_bilinear(x2, (26, 26))
    assert y2.shape == (1, 3, 26, 26)
    assert jnp.allclose(y2, y2_ref, atol=1e-4, rtol=1e-4), "odd-shape mismatch"

    # bf16 inputs use bf16 MXU operands with f32 accumulation.
    xb = x.astype(jnp.bfloat16)
    yb = jax.block_until_ready(interpolate_bilinear(xb, size))
    assert yb.dtype == jnp.bfloat16
    assert jnp.allclose(yb.astype(jnp.float32),
                        _reference_bilinear(xb, size).astype(jnp.float32),
                        atol=5e-2, rtol=5e-2), "bf16 path mismatch"

    # Module-style wrapper (scale_factor form), same semantics as the PyTorch class.
    ym = jax.block_until_ready(Interpolate(scale_factor=2)(x))
    assert jnp.allclose(ym, y_ref, atol=1e-4, rtol=1e-4), "module wrapper mismatch"

    print("KERNEL_OK")
</pallas_src>

<mosaic_0001>
module attributes {stable_mosaic.version = 11 : i64} {
  func.func @_kron_kernel(%arg0: i32, %arg1: memref<256x1024xf32, #tpu.memory_space<vmem>>, %arg2: memref<8x256xf32, #tpu.memory_space<vmem>>, %arg3: memref<8x1024xf32, #tpu.memory_space<vmem>>) attributes {dimension_semantics = [#tpu.dimension_semantics<parallel>], iteration_bounds = array<i64: 1>, scalar_prefetch = 0 : i64, scratch_operands = 0 : i64, tpu.core_type = #tpu.core_type<tc>, window_params = [{pipeline_mode = #tpu.pipeline_mode<synchronous>, transform_indices = @transform_0, window_bounds = array<i64: 256, 1024>}, {transform_indices = @transform_1, window_bounds = array<i64: 8, 256>}, {transform_indices = @transform_2, window_bounds = array<i64: 8, 1024>}]} {
    %c0 = arith.constant 0 : index
    %c0_0 = arith.constant 0 : index
    %0 = vector.load %arg2[%c0, %c0_0] : memref<8x256xf32, #tpu.memory_space<vmem>>, vector<8x256xf32>
    %c0_1 = arith.constant 0 : index
    %c0_2 = arith.constant 0 : index
    %1 = vector.load %arg1[%c0_1, %c0_2] : memref<256x1024xf32, #tpu.memory_space<vmem>>, vector<256x1024xf32>
    %cst = arith.constant dense<0.000000e+00> : vector<8x1024xf32>
    %2 = tpu.matmul %0, %1, %cst {dimension_numbers = #tpu.dot_dimension_numbers<[1], [0], [0], [1], [0, 0, 1, 1], [], []>} : vector<8x256xf32>, vector<256x1024xf32>, vector<8x1024xf32> -> vector<8x1024xf32>
    %c0_3 = arith.constant 0 : index
    %c0_4 = arith.constant 0 : index
    %3 = vector.load %arg3[%c0_3, %c0_4] : memref<8x1024xf32, #tpu.memory_space<vmem>>, vector<8x1024xf32>
    tpu.vector_store %arg3[%c0_3, %c0_4], %2 {strides = array<i32>} : memref<8x1024xf32, #tpu.memory_space<vmem>>, vector<8x1024xf32>,
    return
  }
  func.func @transform_0(%arg0: i32) -> (i32, i32) {
    %c0_i32 = arith.constant 0 : i32
    %c0_i32_0 = arith.constant 0 : i32
    %c0_i32_1 = arith.constant 0 : i32
    return %c0_i32, %c0_i32_0 : i32, i32
  }
  func.func @transform_1(%arg0: i32) -> (i32, i32) {
    %c0_i32 = arith.constant 0 : i32
    %c0_i32_0 = arith.constant 0 : i32
    return %arg0, %c0_i32 : i32, i32
  }
  func.func @transform_2(%arg0: i32) -> (i32, i32) {
    %c0_i32 = arith.constant 0 : i32
    %c0_i32_0 = arith.constant 0 : i32
    return %arg0, %c0_i32 : i32, i32
  }
}

</mosaic_0001>

<bundles_post_ra>
// kernel: interpolate_bilinear.1
= control target key start
LH: loop header
LB: loop body
LE: loop exit
PB: predicated region body
PF: predicated region fallthrough
CT: control target
= control target key end

     0   :  { %s1390_s0 = inlined_call_operand.vmem [shape: f32[256,1024], index: 0, kind: input, shape index: {}]   ;;  %s1391_s1 = inlined_call_operand.vmem [shape: f32[8,256], index: 1, kind: input, shape index: {}]   ;;  %s1392_s2 = inlined_call_operand.vmem [shape: f32[8,1024], index: 2, kind: output, shape index: {}]  }
   0x1   :  { %v134_v0 = vld [vmem:[%s1390_s0 + $0x3c8] sm:$0xff]  ;;  %v136_v1 = vld [vmem:[%s1390_s0 + $0x3d8] sm:$0xff]  ;;  %v133_v2 = vld [vmem:[%s1390_s0 + $0x3c0] sm:$0xff] }
   0x2   :  { %269 = vmatprep.subr.mxu0 %v134_v0  ;;  %340 = vmatprep.subr.mxu1 %v136_v1  ;;  %v135_v3 = vld [vmem:[%s1390_s0 + $0x3d0] sm:$0xff]  ;;  %v126_v4 = vld [vmem:[%s1390_s0 + $0x388] sm:$0xff]  ;;  %v128_v5 = vld [vmem:[%s1390_s0 + $0x398] sm:$0xff] }
   0x3   :  { %270 = vmatpush1.msra.mxu0 %v133_v2  ;;  %341 = vmatpush1.msra.mxu1 %v135_v3  ;;  %v125_v6 = vld [vmem:[%s1390_s0 + $0x380] sm:$0xff]  ;;  %v127_v7 = vld [vmem:[%s1390_s0 + $0x390] sm:$0xff]  ;;  %v118_v8 = vld [vmem:[%s1390_s0 + $0x348] sm:$0xff] }
   0x4   :  { %271 = vmatprep.subr.mxu0 %v126_v4  ;;  %342 = vmatprep.subr.mxu1 %v128_v5  ;;  %v120_v9 = vld [vmem:[%s1390_s0 + $0x358] sm:$0xff]  ;;  %v117_v10 = vld [vmem:[%s1390_s0 + $0x340] sm:$0xff]  ;;  %v119_v11 = vld [vmem:[%s1390_s0 + $0x350] sm:$0xff] }
   0x5   :  { %272 = vmatpush1.msra.mxu0 %v125_v6  ;;  %343 = vmatpush1.msra.mxu1 %v127_v7  ;;  %v110_v12 = vld [vmem:[%s1390_s0 + $0x308] sm:$0xff]  ;;  %v112_v13 = vld [vmem:[%s1390_s0 + $0x318] sm:$0xff]  ;;  %v109_v14 = vld [vmem:[%s1390_s0 + $0x300] sm:$0xff] }
   0x6   :  { %273 = vmatprep.subr.mxu0 %v118_v8  ;;  %344 = vmatprep.subr.mxu1 %v120_v9  ;;  %v111_v15 = vld [vmem:[%s1390_s0 + $0x310] sm:$0xff]  ;;  %v102_v16 = vld [vmem:[%s1390_s0 + $0x2c8] sm:$0xff]  ;;  %v104_v17 = vld [vmem:[%s1390_s0 + $0x2d8] sm:$0xff] }
   0x7   :  { %274 = vmatpush1.msra.mxu0 %v117_v10  ;;  %345 = vmatpush1.msra.mxu1 %v119_v11  ;;  %v101_v18 = vld [vmem:[%s1390_s0 + $0x2c0] sm:$0xff]  ;;  %v103_v19 = vld [vmem:[%s1390_s0 + $0x2d0] sm:$0xff]  ;;  %v94_v20 = vld [vmem:[%s1390_s0 + $0x288] sm:$0xff] }
   0x8   :  { %275 = vmatprep.subr.mxu0 %v110_v12  ;;  %346 = vmatprep.subr.mxu1 %v112_v13  ;;  %v96_v21 = vld [vmem:[%s1390_s0 + $0x298] sm:$0xff]  ;;  %v93_v22 = vld [vmem:[%s1390_s0 + $0x280] sm:$0xff]  ;;  %v95_v23 = vld [vmem:[%s1390_s0 + $0x290] sm:$0xff] }
   0x9   :  { %276 = vmatpush1.msra.mxu0 %v109_v14  ;;  %347 = vmatpush1.msra.mxu1 %v111_v15  ;;  %v86_v24 = vld [vmem:[%s1390_s0 + $0x248] sm:$0xff]  ;;  %v88_v25 = vld [vmem:[%s1390_s0 + $0x258] sm:$0xff]  ;;  %v85_v26 = vld [vmem:[%s1390_s0 + $0x240] sm:$0xff] }
   0xa   :  { %277 = vmatprep.subr.mxu0 %v102_v16  ;;  %348 = vmatprep.subr.mxu1 %v104_v17  ;;  %v87_v27 = vld [vmem:[%s1390_s0 + $0x250] sm:$0xff]  ;;  %v78_v28 = vld [vmem:[%s1390_s0 + $0x208] sm:$0xff]  ;;  %v80_v29 = vld [vmem:[%s1390_s0 + $0x218] sm:$0xff] }
   0xb   :  { %278 = vmatpush1.msra.mxu0 %v101_v18  ;;  %349 = vmatpush1.msra.mxu1 %v103_v19  ;;  %v77_v30 = vld [vmem:[%s1390_s0 + $0x200] sm:$0xff]  ;;  %v79_v31 = vld [vmem:[%s1390_s0 + $0x210] sm:$0xff]  ;;  %v70_v32 = vld [vmem:[%s1390_s0 + $0x1c8] sm:$0xff] }
   0xc   :  { %279 = vmatprep.subr.mxu0 %v94_v20  ;;  %350 = vmatprep.subr.mxu1 %v96_v21  ;;  %v72_v33 = vld [vmem:[%s1390_s0 + $0x1d8] sm:$0xff]  ;;  %v69_v34 = vld [vmem:[%s1390_s0 + $0x1c0] sm:$0xff]  ;;  %v71_v35 = vld [vmem:[%s1390_s0 + $0x1d0] sm:$0xff] }
   0xd   :  { %280 = vmatpush1.msra.mxu0 %v93_v22  ;;  %351 = vmatpush1.msra.mxu1 %v95_v23  ;;  %v62_v36 = vld [vmem:[%s1390_s0 + $0x188] sm:$0xff]  ;;  %v64_v37 = vld [vmem:[%s1390_s0 + $0x198] sm:$0xff]  ;;  %v61_v38 = vld [vmem:[%s1390_s0 + $0x180] sm:$0xff] }
   0xe   :  { %281 = vmatprep.subr.mxu0 %v86_v24  ;;  %352 = vmatprep.subr.mxu1 %v88_v25  ;;  %v63_v39 = vld [vmem:[%s1390_s0 + $0x190] sm:$0xff]  ;;  %v54_v40 = vld [vmem:[%s1390_s0 + $0x148] sm:$0xff]  ;;  %v56_v41 = vld [vmem:[%s1390_s0 + $0x158] sm:$0xff] }
   0xf   :  { %282 = vmatpush1.msra.mxu0 %v85_v26  ;;  %353 = vmatpush1.msra.mxu1 %v87_v27  ;;  %v53_v42 = vld [vmem:[%s1390_s0 + $0x140] sm:$0xff]  ;;  %v55_v43 = vld [vmem:[%s1390_s0 + $0x150] sm:$0xff]  ;;  %v46_v44 = vld [vmem:[%s1390_s0 + $0x108] sm:$0xff] }
  0x10   :  { %283 = vmatprep.subr.mxu0 %v78_v28  ;;  %354 = vmatprep.subr.mxu1 %v80_v29  ;;  %v48_v45 = vld [vmem:[%s1390_s0 + $0x118] sm:$0xff]  ;;  %v45_v46 = vld [vmem:[%s1390_s0 + $0x100] sm:$0xff]  ;;  %v47_v47 = vld [vmem:[%s1390_s0 + $0x110] sm:$0xff] }
  0x11   :  { %284 = vmatpush1.msra.mxu0 %v77_v30  ;;  %355 = vmatpush1.msra.mxu1 %v79_v31  ;;  %v38_v48 = vld [vmem:[%s1390_s0 + $0xc8] sm:$0xff]  ;;  %v40_v49 = vld [vmem:[%s1390_s0 + $0xd8] sm:$0xff]  ;;  %v37_v50 = vld [vmem:[%s1390_s0 + $0xc0] sm:$0xff] }
  0x12   :  { %285 = vmatprep.subr.mxu0 %v70_v32  ;;  %356 = vmatprep.subr.mxu1 %v72_v33  ;;  %v39_v51 = vld [vmem:[%s1390_s0 + $0xd0] sm:$0xff]  ;;  %v30_v52 = vld [vmem:[%s1390_s0 + $0x88] sm:$0xff]  ;;  %v32_v53 = vld [vmem:[%s1390_s0 + $0x98] sm:$0xff] }
  0x13   :  { %286 = vmatpush1.msra.mxu0 %v69_v34  ;;  %357 = vmatpush1.msra.mxu1 %v71_v35  ;;  %v29_v54 = vld [vmem:[%s1390_s0 + $0x80] sm:$0xff]  ;;  %v31_v55 = vld [vmem:[%s1390_s0 + $0x90] sm:$0xff]  ;;  %v22_v56 = vld [vmem:[%s1390_s0 + $0x48] sm:$0xff] }
  0x14   :  { %287 = vmatprep.subr.mxu0 %v62_v36  ;;  %358 = vmatprep.subr.mxu1 %v64_v37  ;;  %v24_v57 = vld [vmem:[%s1390_s0 + $0x58] sm:$0xff]  ;;  %v21_v58 = vld [vmem:[%s1390_s0 + $0x40] sm:$0xff]  ;;  %v23_v59 = vld [vmem:[%s1390_s0 + $0x50] sm:$0xff] }
  0x15   :  { %288 = vmatpush1.msra.mxu0 %v61_v38  ;;  %359 = vmatpush1.msra.mxu1 %v63_v39  ;;  %v14_v60 = vld [vmem:[%s1390_s0 + $0x8] sm:$0xff]  ;;  %v16_v61 = vld [vmem:[%s1390_s0 + $0x18] sm:$0xff]  ;;  %v13_v62 = vld [vmem:[%s1390_s0] sm:$0xff] }
  0x16   :  { %289 = vmatprep.subr.mxu0 %v54_v40  ;;  %360 = vmatprep.subr.mxu1 %v56_v41  ;;  %v15_v63 = vld [vmem:[%s1390_s0 + $0x10] sm:$0xff]  ;;  %v262_v0 = vld [vmem:[%s1390_s0 + $0x7c8] sm:$0xff]  ;;  %v264_v1 = vld [vmem:[%s1390_s0 + $0x7d8] sm:$0xff] }
  0x17   :  { %290 = vmatpush1.msra.mxu0 %v53_v42  ;;  %361 = vmatpush1.msra.mxu1 %v55_v43  ;;  %v261_v2 = vld [vmem:[%s1390_s0 + $0x7c0] sm:$0xff]  ;;  %v263_v3 = vld [vmem:[%s1390_s0 + $0x7d0] sm:$0xff]  ;;  %v254_v4 = vld [vmem:[%s1390_s0 + $0x788] sm:$0xff] }
  0x18   :  { %291 = vmatprep.subr.mxu0 %v46_v44  ;;  %362 = vmatprep.subr.mxu1 %v48_v45  ;;  %v256_v5 = vld [vmem:[%s1390_s0 + $0x798] sm:$0xff]  ;;  %v253_v6 = vld [vmem:[%s1390_s0 + $0x780] sm:$0xff]  ;;  %v255_v7 = vld [vmem:[%s1390_s0 + $0x790] sm:$0xff] }
  0x19   :  { %292 = vmatpush1.msra.mxu0 %v45_v46  ;;  %363 = vmatpush1.msra.mxu1 %v47_v47  ;;  %v246_v8 = vld [vmem:[%s1390_s0 + $0x748] sm:$0xff]  ;;  %v248_v9 = vld [vmem:[%s1390_s0 + $0x758] sm:$0xff]  ;;  %v245_v10 = vld [vmem:[%s1390_s0 + $0x740] sm:$0xff] }
  0x1a   :  { %293 = vmatprep.subr.mxu0 %v38_v48  ;;  %364 = vmatprep.subr.mxu1 %v40_v49  ;;  %v247_v11 = vld [vmem:[%s1390_s0 + $0x750] sm:$0xff]  ;;  %v238_v12 = vld [vmem:[%s1390_s0 + $0x708] sm:$0xff]  ;;  %v240_v13 = vld [vmem:[%s1390_s0 + $0x718] sm:$0xff] }
  0x1b   :  { %294 = vmatpush1.msra.mxu0 %v37_v50  ;;  %365 = vmatpush1.msra.mxu1 %v39_v51  ;;  %v237_v14 = vld [vmem:[%s1390_s0 + $0x700] sm:$0xff]  ;;  %v239_v15 = vld [vmem:[%s1390_s0 + $0x710] sm:$0xff]  ;;  %v230_v16 = vld [vmem:[%s1390_s0 + $0x6c8] sm:$0xff] }
  0x1c   :  { %295 = vmatprep.subr.mxu0 %v30_v52  ;;  %366 = vmatprep.subr.mxu1 %v32_v53  ;;  %v232_v17 = vld [vmem:[%s1390_s0 + $0x6d8] sm:$0xff]  ;;  %v229_v18 = vld [vmem:[%s1390_s0 + $0x6c0] sm:$0xff]  ;;  %v231_v19 = vld [vmem:[%s1390_s0 + $0x6d0] sm:$0xff] }
  0x1d   :  { %296 = vmatpush1.msra.mxu0 %v29_v54  ;;  %367 = vmatpush1.msra.mxu1 %v31_v55  ;;  %v222_v20 = vld [vmem:[%s1390_s0 + $0x688] sm:$0xff]  ;;  %v224_v21 = vld [vmem:[%s1390_s0 + $0x698] sm:$0xff]  ;;  %v221_v22 = vld [vmem:[%s1390_s0 + $0x680] sm:$0xff] }
  0x1e   :  { %297 = vmatprep.subr.mxu0 %v22_v56  ;;  %368 = vmatprep.subr.mxu1 %v24_v57  ;;  %v223_v23 = vld [vmem:[%s1390_s0 + $0x690] sm:$0xff]  ;;  %v214_v24 = vld [vmem:[%s1390_s0 + $0x648] sm:$0xff]  ;;  %v216_v25 = vld [vmem:[%s1390_s0 + $0x658] sm:$0xff] }
  0x1f   :  { %298 = vmatpush1.msra.mxu0 %v21_v58  ;;  %369 = vmatpush1.msra.mxu1 %v23_v59  ;;  %v213_v26 = vld [vmem:[%s1390_s0 + $0x640] sm:$0xff]  ;;  %v215_v27 = vld [vmem:[%s1390_s0 + $0x650] sm:$0xff]  ;;  %v206_v28 = vld [vmem:[%s1390_s0 + $0x608] sm:$0xff] }
  0x20   :  { %299 = vmatprep.subr.mxu0 %v14_v60  ;;  %370 = vmatprep.subr.mxu1 %v16_v61  ;;  %v208_v29 = vld [vmem:[%s1390_s0 + $0x618] sm:$0xff]  ;;  %v205_v30 = vld [vmem:[%s1390_s0 + $0x600] sm:$0xff]  ;;  %v207_v31 = vld [vmem:[%s1390_s0 + $0x610] sm:$0xff] }
  0x21   :  { %300 = vmatpush1.msra.mxu0 %v13_v62  ;;  %371 = vmatpush1.msra.mxu1 %v15_v63  ;;  %v198_v32 = vld [vmem:[%s1390_s0 + $0x5c8] sm:$0xff]  ;;  %v200_v33 = vld [vmem:[%s1390_s0 + $0x5d8] sm:$0xff]  ;;  %v197_v34 = vld [vmem:[%s1390_s0 + $0x5c0] sm:$0xff] }
  0x22   :  { %301 = vmatprep.subr.mxu0 %v262_v0  ;;  %372 = vmatprep.subr.mxu1 %v264_v1  ;;  %v199_v35 = vld [vmem:[%s1390_s0 + $0x5d0] sm:$0xff]  ;;  %v190_v36 = vld [vmem:[%s1390_s0 + $0x588] sm:$0xff]  ;;  %v192_v37 = vld [vmem:[%s1390_s0 + $0x598] sm:$0xff] }
  0x23   :  { %302 = vmatpush2.msra.mxu0 %v261_v2  ;;  %373 = vmatpush2.msra.mxu1 %v263_v3  ;;  %v189_v38 = vld [vmem:[%s1390_s0 + $0x580] sm:$0xff]  ;;  %v191_v39 = vld [vmem:[%s1390_s0 + $0x590] sm:$0xff]  ;;  %v182_v40 = vld [vmem:[%s1390_s0 + $0x548] sm:$0xff] }
  0x24   :  { %303 = vmatprep.subr.mxu0 %v254_v4  ;;  %374 = vmatprep.subr.mxu1 %v256_v5  ;;  %v184_v41 = vld [vmem:[%s1390_s0 + $0x558] sm:$0xff]  ;;  %v181_v42 = vld [vmem:[%s1390_s0 + $0x540] sm:$0xff]  ;;  %v183_v43 = vld [vmem:[%s1390_s0 + $0x550] sm:$0xff] }
  0x25   :  { %304 = vmatpush2.msra.mxu0 %v253_v6  ;;  %375 = vmatpush2.msra.mxu1 %v255_v7  ;;  %v174_v44 = vld [vmem:[%s1390_s0 + $0x508] sm:$0xff]  ;;  %v176_v45 = vld [vmem:[%s1390_s0 + $0x518] sm:$0xff]  ;;  %v173_v46 = vld [vmem:[%s1390_s0 + $0x500] sm:$0xff] }
  0x26   :  { %305 = vmatprep.subr.mxu0 %v246_v8  ;;  %376 = vmatprep.subr.mxu1 %v248_v9  ;;  %v175_v47 = vld [vmem:[%s1390_s0 + $0x510] sm:$0xff]  ;;  %v166_v48 = vld [vmem:[%s1390_s0 + $0x4c8] sm:$0xff]  ;;  %v168_v49 = vld [vmem:[%s1390_s0 + $0x4d8] sm:$0xff] }
  0x27   :  { %306 = vmatpush2.msra.mxu0 %v245_v10  ;;  %377 = vmatpush2.msra.mxu1 %v247_v11  ;;  %v165_v50 = vld [vmem:[%s1390_s0 + $0x4c0] sm:$0xff]  ;;  %v167_v51 = vld [vmem:[%s1390_s0 + $0x4d0] sm:$0xff]  ;;  %v158_v52 = vld [vmem:[%s1390_s0 + $0x488] sm:$0xff] }
  0x28   :  { %307 = vmatprep.subr.mxu0 %v238_v12  ;;  %378 = vmatprep.subr.mxu1 %v240_v13  ;;  %v160_v53 = vld [vmem:[%s1390_s0 + $0x498] sm:$0xff]  ;;  %v157_v54 = vld [vmem:[%s1390_s0 + $0x480] sm:$0xff]  ;;  %v159_v55 = vld [vmem:[%s1390_s0 + $0x490] sm:$0xff] }
  0x29   :  { %308 = vmatpush2.msra.mxu0 %v237_v14  ;;  %379 = vmatpush2.msra.mxu1 %v239_v15  ;;  %v150_v56 = vld [vmem:[%s1390_s0 + $0x448] sm:$0xff]  ;;  %v152_v57 = vld [vmem:[%s1390_s0 + $0x458] sm:$0xff]  ;;  %v149_v58 = vld [vmem:[%s1390_s0 + $0x440] sm:$0xff] }
  0x2a   :  { %309 = vmatprep.subr.mxu0 %v230_v16  ;;  %380 = vmatprep.subr.mxu1 %v232_v17  ;;  %v151_v59 = vld [vmem:[%s1390_s0 + $0x450] sm:$0xff]  ;;  %v142_v60 = vld [vmem:[%s1390_s0 + $0x408] sm:$0xff]  ;;  %v144_v61 = vld [vmem:[%s1390_s0 + $0x418] sm:$0xff] }
  0x2b   :  { %310 = vmatpush2.msra.mxu0 %v229_v18  ;;  %381 = vmatpush2.msra.mxu1 %v231_v19  ;;  %v141_v62 = vld [vmem:[%s1390_s0 + $0x400] sm:$0xff]  ;;  %v964_v63 = vld [vmem:[%s1391_s1 + $0x8] sm:$0xff]  ;;  %v143_v0 = vld [vmem:[%s1390_s0 + $0x410] sm:$0xff] }
  0x2c   :  { %311 = vmatprep.subr.mxu0 %v222_v20  ;;  %382 = vmatprep.subr.mxu1 %v224_v21  ;;  %v972_v1 = vld [vmem:[%s1391_s1] sm:$0xff]  ;;  %v138_v2 = vld [vmem:[%s1390_s0 + $0x3e8] sm:$0xff]  ;;  %v140_v3 = vld [vmem:[%s1390_s0 + $0x3f8] sm:$0xff] }
  0x2d   :  { %312 = vmatpush2.msra.mxu0 %v221_v22  ;;  %383 = vmatpush2.msra.mxu1 %v223_v23  ;;  %v137_v4 = vld [vmem:[%s1390_s0 + $0x3e0] sm:$0xff]  ;;  %v139_v5 = vld [vmem:[%s1390_s0 + $0x3f0] sm:$0xff]  ;;  %v130_v6 = vld [vmem:[%s1390_s0 + $0x3a8] sm:$0xff] }
  0x2e   :  { %313 = vmatprep.subr.mxu0 %v214_v24  ;;  %384 = vmatprep.subr.mxu1 %v216_v25  ;;  %v132_v7 = vld [vmem:[%s1390_s0 + $0x3b8] sm:$0xff]  ;;  %v129_v8 = vld [vmem:[%s1390_s0 + $0x3a0] sm:$0xff]  ;;  %v131_v9 = vld [vmem:[%s1390_s0 + $0x3b0] sm:$0xff] }
  0x2f   :  { %314 = vmatpush2.msra.mxu0 %v213_v26  ;;  %385 = vmatpush2.msra.mxu1 %v215_v27  ;;  %v122_v10 = vld [vmem:[%s1390_s0 + $0x368] sm:$0xff]  ;;  %v124_v11 = vld [vmem:[%s1390_s0 + $0x378] sm:$0xff]  ;;  %v121_v12 = vld [vmem:[%s1390_s0 + $0x360] sm:$0xff] }
  0x30   :  { %315 = vmatprep.subr.mxu0 %v206_v28  ;;  %386 = vmatprep.subr.mxu1 %v208_v29  ;;  %v123_v13 = vld [vmem:[%s1390_s0 + $0x370] sm:$0xff]  ;;  %v114_v14 = vld [vmem:[%s1390_s0 + $0x328] sm:$0xff]  ;;  %v116_v15 = vld [vmem:[%s1390_s0 + $0x338] sm:$0xff] }
  0x31   :  { %316 = vmatpush2.msra.mxu0 %v205_v30  ;;  %387 = vmatpush2.msra.mxu1 %v207_v31  ;;  %v113_v16 = vld [vmem:[%s1390_s0 + $0x320] sm:$0xff]  ;;  %v115_v17 = vld [vmem:[%s1390_s0 + $0x330] sm:$0xff]  ;;  %v106_v18 = vld [vmem:[%s1390_s0 + $0x2e8] sm:$0xff] }
  0x32   :  { %317 = vmatprep.subr.mxu0 %v198_v32  ;;  %388 = vmatprep.subr.mxu1 %v200_v33  ;;  %v108_v19 = vld [vmem:[%s1390_s0 + $0x2f8] sm:$0xff]  ;;  %v105_v20 = vld [vmem:[%s1390_s0 + $0x2e0] sm:$0xff]  ;;  %v107_v21 = vld [vmem:[%s1390_s0 + $0x2f0] sm:$0xff] }
  0x33   :  { %318 = vmatpush2.msra.mxu0 %v197_v34  ;;  %389 = vmatpush2.msra.mxu1 %v199_v35  ;;  %v98_v22 = vld [vmem:[%s1390_s0 + $0x2a8] sm:$0xff]  ;;  %v100_v23 = vld [vmem:[%s1390_s0 + $0x2b8] sm:$0xff]  ;;  %v97_v24 = vld [vmem:[%s1390_s0 + $0x2a0] sm:$0xff] }
  0x34   :  { %319 = vmatprep.subr.mxu0 %v190_v36  ;;  %390 = vmatprep.subr.mxu1 %v192_v37  ;;  %v99_v25 = vld [vmem:[%s1390_s0 + $0x2b0] sm:$0xff]  ;;  %v90_v26 = vld [vmem:[%s1390_s0 + $0x268] sm:$0xff]  ;;  %v92_v27 = vld [vmem:[%s1390_s0 + $0x278] sm:$0xff] }
  0x35   :  { %320 = vmatpush2.msra.mxu0 %v189_v38  ;;  %391 = vmatpush2.msra.mxu1 %v191_v39  ;;  %v89_v28 = vld [vmem:[%s1390_s0 + $0x260] sm:$0xff]  ;;  %v91_v29 = vld [vmem:[%s1390_s0 + $0x270] sm:$0xff]  ;;  %v82_v30 = vld [vmem:[%s1390_s0 + $0x228] sm:$0xff] }
  0x36   :  { %321 = vmatprep.subr.mxu0 %v182_v40  ;;  %392 = vmatprep.subr.mxu1 %v184_v41  ;;  %v84_v31 = vld [vmem:[%s1390_s0 + $0x238] sm:$0xff]  ;;  %v81_v32 = vld [vmem:[%s1390_s0 + $0x220] sm:$0xff]  ;;  %v83_v33 = vld [vmem:[%s1390_s0 + $0x230] sm:$0xff] }
  0x37   :  { %322 = vmatpush2.msra.mxu0 %v181_v42  ;;  %393 = vmatpush2.msra.mxu1 %v183_v43  ;;  %v74_v34 = vld [vmem:[%s1390_s0 + $0x1e8] sm:$0xff]  ;;  %v76_v35 = vld [vmem:[%s1390_s0 + $0x1f8] sm:$0xff]  ;;  %v73_v36 = vld [vmem:[%s1390_s0 + $0x1e0] sm:$0xff] }
  0x38   :  { %323 = vmatprep.subr.mxu0 %v174_v44  ;;  %394 = vmatprep.subr.mxu1 %v176_v45  ;;  %v75_v37 = vld [vmem:[%s1390_s0 + $0x1f0] sm:$0xff]  ;;  %v66_v38 = vld [vmem:[%s1390_s0 + $0x1a8] sm:$0xff]  ;;  %v68_v39 = vld [vmem:[%s1390_s0 + $0x1b8] sm:$0xff] }
  0x39   :  { %324 = vmatpush2.msra.mxu0 %v173_v46  ;;  %395 = vmatpush2.msra.mxu1 %v175_v47  ;;  %v65_v40 = vld [vmem:[%s1390_s0 + $0x1a0] sm:$0xff]  ;;  %v67_v41 = vld [vmem:[%s1390_s0 + $0x1b0] sm:$0xff]  ;;  %v58_v42 = vld [vmem:[%s1390_s0 + $0x168] sm:$0xff] }
  0x3a   :  { %325 = vmatprep.subr.mxu0 %v166_v48  ;;  %396 = vmatprep.subr.mxu1 %v168_v49  ;;  %v60_v43 = vld [vmem:[%s1390_s0 + $0x178] sm:$0xff]  ;;  %v57_v44 = vld [vmem:[%s1390_s0 + $0x160] sm:$0xff]  ;;  %v59_v45 = vld [vmem:[%s1390_s0 + $0x170] sm:$0xff] }
  0x3b   :  { %326 = vmatpush2.msra.mxu0 %v165_v50  ;;  %397 = vmatpush2.msra.mxu1 %v167_v51  ;;  %v50_v46 = vld [vmem:[%s1390_s0 + $0x128] sm:$0xff]  ;;  %v52_v47 = vld [vmem:[%s1390_s0 + $0x138] sm:$0xff]  ;;  %v49_v48 = vld [vmem:[%s1390_s0 + $0x120] sm:$0xff] }
  0x3c   :  { %327 = vmatprep.subr.mxu0 %v158_v52  ;;  %398 = vmatprep.subr.mxu1 %v160_v53  ;;  %v51_v49 = vld [vmem:[%s1390_s0 + $0x130] sm:$0xff]  ;;  %v42_v50 = vld [vmem:[%s1390_s0 + $0xe8] sm:$0xff]  ;;  %v44_v51 = vld [vmem:[%s1390_s0 + $0xf8] sm:$0xff] }
  0x3d   :  { %328 = vmatpush2.msra.mxu0 %v157_v54  ;;  %399 = vmatpush2.msra.mxu1 %v159_v55  ;;  %v41_v52 = vld [vmem:[%s1390_s0 + $0xe0] sm:$0xff]  ;;  %v43_v53 = vld [vmem:[%s1390_s0 + $0xf0] sm:$0xff]  ;;  %v34_v54 = vld [vmem:[%s1390_s0 + $0xa8] sm:$0xff] }
  0x3e   :  { %329 = vmatprep.subr.mxu0 %v150_v56  ;;  %400 = vmatprep.subr.mxu1 %v152_v57  ;;  %v36_v55 = vld [vmem:[%s1390_s0 + $0xb8] sm:$0xff]  ;;  %v33_v56 = vld [vmem:[%s1390_s0 + $0xa0] sm:$0xff]  ;;  %v35_v57 = vld [vmem:[%s1390_s0 + $0xb0] sm:$0xff] }
  0x3f   :  { %330 = vmatpush2.msra.mxu0 %v149_v58  ;;  %401 = vmatpush2.msra.mxu1 %v151_v59  ;;  %v26_v58 = vld [vmem:[%s1390_s0 + $0x68] sm:$0xff]  ;;  %v28_v59 = vld [vmem:[%s1390_s0 + $0x78] sm:$0xff] }
  0x40   :  { %331 = vmatprep.subr.mxu0 %v142_v60  ;;  %402 = vmatprep.subr.mxu1 %v144_v61  ;;  %v25_v60 = vld [vmem:[%s1390_s0 + $0x60] sm:$0xff]  ;;  %v27_v61 = vld [vmem:[%s1390_s0 + $0x70] sm:$0xff] }
  0x41   :  { %332 = vmatpush2.msra.mxu0 %v141_v62  ;;  %333 = vmatprep.mubr.f32.mxu0 %v964_v63  ;;  %v18_v62 = vld [vmem:[%s1390_s0 + $0x28] sm:$0xff] }
  0x42   :  { %403 = vmatpush2.msra.mxu1 %v143_v0  ;;  %404 = vmatprep.mubr.f32.mxu1 %v964_v63  ;;  %v20_v0 = vld [vmem:[%s1390_s0 + $0x38] sm:$0xff] }
  0x43   :  { %334 = vmatmul.mubr.f32.vlgmr.msra.gmra.mxu0 %v972_v1  ;;  %405 = vmatmul.mubr.f32.vlgmr.msra.gmra.mxu1 %v972_v1 }
  0x44   :  { %411 = vmatprep.subr.mxu0 %v138_v2  ;;  %482 = vmatprep.subr.mxu1 %v140_v3  ;;  %v17_v2 = vld [vmem:[%s1390_s0 + $0x20] sm:$0xff]  ;;  %v19_v3 = vld [vmem:[%s1390_s0 + $0x30] sm:$0xff] }
  0x45   :  { %412 = vmatpush1.msra.mxu0 %v137_v4  ;;  %483 = vmatpush1.msra.mxu1 %v139_v5  ;;  %v266_v4 = vld [vmem:[%s1390_s0 + $0x7e8] sm:$0xff]  ;;  %v268_v5 = vld [vmem:[%s1390_s0 + $0x7f8] sm:$0xff] }
  0x46   :  { %413 = vmatprep.subr.mxu0 %v130_v6  ;;  %484 = vmatprep.subr.mxu1 %v132_v7  ;;  %v265_v6 = vld [vmem:[%s1390_s0 + $0x7e0] sm:$0xff]  ;;  %v267_v7 = vld [vmem:[%s1390_s0 + $0x7f0] sm:$0xff] }
  0x47   :  { %414 = vmatpush1.msra.mxu0 %v129_v8  ;;  %485 = vmatpush1.msra.mxu1 %v131_v9  ;;  %v258_v8 = vld [vmem:[%s1390_s0 + $0x7a8] sm:$0xff]  ;;  %v260_v9 = vld [vmem:[%s1390_s0 + $0x7b8] sm:$0xff] }
  0x48   :  { %415 = vmatprep.subr.mxu0 %v122_v10  ;;  %486 = vmatprep.subr.mxu1 %v124_v11  ;;  %v257_v10 = vld [vmem:[%s1390_s0 + $0x7a0] sm:$0xff]  ;;  %v259_v11 = vld [vmem:[%s1390_s0 + $0x7b0] sm:$0xff] }
  0x49   :  { %416 = vmatpush1.msra.mxu0 %v121_v12  ;;  %487 = vmatpush1.msra.mxu1 %v123_v13  ;;  %v250_v12 = vld [vmem:[%s1390_s0 + $0x768] sm:$0xff]  ;;  %v252_v13 = vld [vmem:[%s1390_s0 + $0x778] sm:$0xff] }
  0x4a   :  { %417 = vmatprep.subr.mxu0 %v114_v14  ;;  %488 = vmatprep.subr.mxu1 %v116_v15  ;;  %v249_v14 = vld [vmem:[%s1390_s0 + $0x760] sm:$0xff]  ;;  %v251_v15 = vld [vmem:[%s1390_s0 + $0x770] sm:$0xff] }
  0x4b   :  { %418 = vmatpush1.msra.mxu0 %v113_v16  ;;  %489 = vmatpush1.msra.mxu1 %v115_v17  ;;  %v242_v16 = vld [vmem:[%s1390_s0 + $0x728] sm:$0xff]  ;;  %v244_v17 = vld [vmem:[%s1390_s0 + $0x738] sm:$0xff] }
  0x4c   :  { %419 = vmatprep.subr.mxu0 %v106_v18  ;;  %490 = vmatprep.subr.mxu1 %v108_v19  ;;  %v241_v18 = vld [vmem:[%s1390_s0 + $0x720] sm:$0xff]  ;;  %v243_v19 = vld [vmem:[%s1390_s0 + $0x730] sm:$0xff] }
  0x4d   :  { %420 = vmatpush1.msra.mxu0 %v105_v20  ;;  %491 = vmatpush1.msra.mxu1 %v107_v21  ;;  %v234_v20 = vld [vmem:[%s1390_s0 + $0x6e8] sm:$0xff]  ;;  %v236_v21 = vld [vmem:[%s1390_s0 + $0x6f8] sm:$0xff] }
  0x4e   :  { %421 = vmatprep.subr.mxu0 %v98_v22  ;;  %492 = vmatprep.subr.mxu1 %v100_v23  ;;  %v233_v22 = vld [vmem:[%s1390_s0 + $0x6e0] sm:$0xff]  ;;  %v235_v23 = vld [vmem:[%s1390_s0 + $0x6f0] sm:$0xff] }
  0x4f   :  { %422 = vmatpush1.msra.mxu0 %v97_v24  ;;  %493 = vmatpush1.msra.mxu1 %v99_v25  ;;  %v226_v24 = vld [vmem:[%s1390_s0 + $0x6a8] sm:$0xff]  ;;  %v228_v25 = vld [vmem:[%s1390_s0 + $0x6b8] sm:$0xff] }
  0x50   :  { %423 = vmatprep.subr.mxu0 %v90_v26  ;;  %494 = vmatprep.subr.mxu1 %v92_v27  ;;  %v225_v26 = vld [vmem:[%s1390_s0 + $0x6a0] sm:$0xff]  ;;  %v227_v27 = vld [vmem:[%s1390_s0 + $0x6b0] sm:$0xff] }
  0x51   :  { %424 = vmatpush1.msra.mxu0 %v89_v28  ;;  %495 = vmatpush1.msra.mxu1 %v91_v29  ;;  %v218_v28 = vld [vmem:[%s1390_s0 + $0x668] sm:$0xff]  ;;  %v220_v29 = vld [vmem:[%s1390_s0 + $0x678] sm:$0xff] }
  0x52   :  { %425 = vmatprep.subr.mxu0 %v82_v30  ;;  %496 = vmatprep.subr.mxu1 %v84_v31  ;;  %v217_v30 = vld [vmem:[%s1390_s0 + $0x660] sm:$0xff]  ;;  %v219_v31 = vld [vmem:[%s1390_s0 + $0x670] sm:$0xff] }
  0x53   :  { %426 = vmatpush1.msra.mxu0 %v81_v32  ;;  %497 = vmatpush1.msra.mxu1 %v83_v33  ;;  %v210_v32 = vld [vmem:[%s1390_s0 + $0x628] sm:$0xff]  ;;  %v212_v33 = vld [vmem:[%s1390_s0 + $0x638] sm:$0xff] }
  0x54   :  { %427 = vmatprep.subr.mxu0 %v74_v34  ;;  %498 = vmatprep.subr.mxu1 %v76_v35  ;;  %v209_v34 = vld [vmem:[%s1390_s0 + $0x620] sm:$0xff]  ;;  %v211_v35 = vld [vmem:[%s1390_s0 + $0x630] sm:$0xff] }
  0x55   :  { %428 = vmatpush1.msra.mxu0 %v73_v36  ;;  %499 = vmatpush1.msra.mxu1 %v75_v37  ;;  %v202_v36 = vld [vmem:[%s1390_s0 + $0x5e8] sm:$0xff]  ;;  %v204_v37 = vld [vmem:[%s1390_s0 + $0x5f8] sm:$0xff] }
  0x56   :  { %429 = vmatprep.subr.mxu0 %v66_v38  ;;  %500 = vmatprep.subr.mxu1 %v68_v39  ;;  %v201_v38 = vld [vmem:[%s1390_s0 + $0x5e0] sm:$0xff]  ;;  %v203_v39 = vld [vmem:[%s1390_s0 + $0x5f0] sm:$0xff] }
  0x57   :  { %430 = vmatpush1.msra.mxu0 %v65_v40  ;;  %501 = vmatpush1.msra.mxu1 %v67_v41  ;;  %v194_v40 = vld [vmem:[%s1390_s0 + $0x5a8] sm:$0xff]  ;;  %v196_v41 = vld [vmem:[%s1390_s0 + $0x5b8] sm:$0xff] }
  0x58   :  { %431 = vmatprep.subr.mxu0 %v58_v42  ;;  %502 = vmatprep.subr.mxu1 %v60_v43  ;;  %v193_v42 = vld [vmem:[%s1390_s0 + $0x5a0] sm:$0xff]  ;;  %v195_v43 = vld [vmem:[%s1390_s0 + $0x5b0] sm:$0xff] }
  0x59   :  { %432 = vmatpush1.msra.mxu0 %v57_v44  ;;  %503 = vmatpush1.msra.mxu1 %v59_v45  ;;  %v186_v44 = vld [vmem:[%s1390_s0 + $0x568] sm:$0xff]  ;;  %v188_v45 = vld [vmem:[%s1390_s0 + $0x578] sm:$0xff] }
  0x5a   :  { %433 = vmatprep.subr.mxu0 %v50_v46  ;;  %504 = vmatprep.subr.mxu1 %v52_v47  ;;  %v185_v46 = vld [vmem:[%s1390_s0 + $0x560] sm:$0xff]  ;;  %v187_v47 = vld [vmem:[%s1390_s0 + $0x570] sm:$0xff] }
  0x5b   :  { %434 = vmatpush1.msra.mxu0 %v49_v48  ;;  %505 = vmatpush1.msra.mxu1 %v51_v49  ;;  %v178_v48 = vld [vmem:[%s1390_s0 + $0x528] sm:$0xff]  ;;  %v180_v49 = vld [vmem:[%s1390_s0 + $0x538] sm:$0xff] }
  0x5c   :  { %435 = vmatprep.subr.mxu0 %v42_v50  ;;  %506 = vmatprep.subr.mxu1 %v44_v51  ;;  %v177_v50 = vld [vmem:[%s1390_s0 + $0x520] sm:$0xff]  ;;  %v179_v51 = vld [vmem:[%s1390_s0 + $0x530] sm:$0xff] }
  0x5d   :  { %436 = vmatpush1.msra.mxu0 %v41_v52  ;;  %507 = vmatpush1.msra.mxu1 %v43_v53  ;;  %v170_v52 = vld [vmem:[%s1390_s0 + $0x4e8] sm:$0xff]  ;;  %v172_v53 = vld [vmem:[%s1390_s0 + $0x4f8] sm:$0xff] }
  0x5e   :  { %437 = vmatprep.subr.mxu0 %v34_v54  ;;  %508 = vmatprep.subr.mxu1 %v36_v55  ;;  %v169_v54 = vld [vmem:[%s1390_s0 + $0x4e0] sm:$0xff]  ;;  %v171_v55 = vld [vmem:[%s1390_s0 + $0x4f0] sm:$0xff] }
  0x5f   :  { %438 = vmatpush1.msra.mxu0 %v33_v56  ;;  %509 = vmatpush1.msra.mxu1 %v35_v57  ;;  %v162_v56 = vld [vmem:[%s1390_s0 + $0x4a8] sm:$0xff]  ;;  %v164_v57 = vld [vmem:[%s1390_s0 + $0x4b8] sm:$0xff] }
  0x60   :  { %439 = vmatprep.subr.mxu0 %v26_v58  ;;  %510 = vmatprep.subr.mxu1 %v28_v59  ;;  %v161_v58 = vld [vmem:[%s1390_s0 + $0x4a0] sm:$0xff]  ;;  %v163_v59 = vld [vmem:[%s1390_s0 + $0x4b0] sm:$0xff] }
  0x61   :  { %440 = vmatpush1.msra.mxu0 %v25_v60  ;;  %511 = vmatpush1.msra.mxu1 %v27_v61  ;;  %v154_v60 = vld [vmem:[%s1390_s0 + $0x468] sm:$0xff]  ;;  %v156_v61 = vld [vmem:[%s1390_s0 + $0x478] sm:$0xff] }
  0x62   :  { %441 = vmatprep.subr.mxu0 %v18_v62  ;;  %512 = vmatprep.subr.mxu1 %v20_v0  ;;  %v153_v62 = vld [vmem:[%s1390_s0 + $0x460] sm:$0xff]  ;;  %v155_v0 = vld [vmem:[%s1390_s0 + $0x470] sm:$0xff] }
  0x63   :  { %442 = vmatpush1.msra.mxu0 %v17_v2  ;;  %513 = vmatpush1.msra.mxu1 %v19_v3  ;;  %v146_v2 = vld [vmem:[%s1390_s0 + $0x428] sm:$0xff]  ;;  %v148_v3 = vld [vmem:[%s1390_s0 + $0x438] sm:$0xff] }
  0x64   :  { %443 = vmatprep.subr.mxu0 %v266_v4  ;;  %514 = vmatprep.subr.mxu1 %v268_v5  ;;  %v145_v4 = vld [vmem:[%s1390_s0 + $0x420] sm:$0xff]  ;;  %v147_v5 = vld [vmem:[%s1390_s0 + $0x430] sm:$0xff] }
  0x65   :  { %444 = vmatpush2.msra.mxu0 %v265_v6  ;;  %515 = vmatpush2.msra.mxu1 %v267_v7 }
  0x66   :  { %445 = vmatprep.subr.mxu0 %v258_v8  ;;  %516 = vmatprep.subr.mxu1 %v260_v9 }
  0x67   :  { %446 = vmatpush2.msra.mxu0 %v257_v10  ;;  %517 = vmatpush2.msra.mxu1 %v259_v11 }
  0x68   :  { %447 = vmatprep.subr.mxu0 %v250_v12  ;;  %518 = vmatprep.subr.mxu1 %v252_v13 }
  0x69   :  { %448 = vmatpush2.msra.mxu0 %v249_v14  ;;  %519 = vmatpush2.msra.mxu1 %v251_v15 }
  0x6a   :  { %449 = vmatprep.subr.mxu0 %v242_v16  ;;  %520 = vmatprep.subr.mxu1 %v244_v17 }
  0x6b   :  { %450 = vmatpush2.msra.mxu0 %v241_v18  ;;  %521 = vmatpush2.msra.mxu1 %v243_v19 }
  0x6c   :  { %451 = vmatprep.subr.mxu0 %v234_v20  ;;  %522 = vmatprep.subr.mxu1 %v236_v21 }
  0x6d   :  { %452 = vmatpush2.msra.mxu0 %v233_v22  ;;  %523 = vmatpush2.msra.mxu1 %v235_v23 }
  0x6e   :  { %453 = vmatprep.subr.mxu0 %v226_v24  ;;  %524 = vmatprep.subr.mxu1 %v228_v25 }
  0x6f   :  { %454 = vmatpush2.msra.mxu0 %v225_v26  ;;  %525 = vmatpush2.msra.mxu1 %v227_v27 }
  0x70   :  { %455 = vmatprep.subr.mxu0 %v218_v28  ;;  %526 = vmatprep.subr.mxu1 %v220_v29 }
  0x71   :  { %456 = vmatpush2.msra.mxu0 %v217_v30  ;;  %527 = vmatpush2.msra.mxu1 %v219_v31 }
  0x72   :  { %457 = vmatprep.subr.mxu0 %v210_v32  ;;  %528 = vmatprep.subr.mxu1 %v212_v33 }
  0x73   :  { %458 = vmatpush2.msra.mxu0 %v209_v34  ;;  %529 = vmatpush2.msra.mxu1 %v211_v35 }
  0x74   :  { %459 = vmatprep.subr.mxu0 %v202_v36  ;;  %530 = vmatprep.subr.mxu1 %v204_v37 }
  0x75   :  { %460 = vmatpush2.msra.mxu0 %v201_v38  ;;  %531 = vmatpush2.msra.mxu1 %v203_v39 }
  0x76   :  { %461 = vmatprep.subr.mxu0 %v194_v40  ;;  %532 = vmatprep.subr.mxu1 %v196_v41 }
  0x77   :  { %462 = vmatpush2.msra.mxu0 %v193_v42  ;;  %533 = vmatpush2.msra.mxu1 %v195_v43 }
  0x78   :  { %463 = vmatprep.subr.mxu0 %v186_v44  ;;  %534 = vmatprep.subr.mxu1 %v188_v45 }
  0x79   :  { %464 = vmatpush2.msra.mxu0 %v185_v46  ;;  %535 = vmatpush2.msra.mxu1 %v187_v47 }
  0x7a   :  { %465 = vmatprep.subr.mxu0 %v178_v48  ;;  %536 = vmatprep.subr.mxu1 %v180_v49 }
  0x7b   :  { %466 = vmatpush2.msra.mxu0 %v177_v50  ;;  %537 = vmatpush2.msra.mxu1 %v179_v51 }
  0x7c   :  { %467 = vmatprep.subr.mxu0 %v170_v52  ;;  %538 = vmatprep.subr.mxu1 %v172_v53 }
  0x7d   :  { %468 = vmatpush2.msra.mxu0 %v169_v54  ;;  %539 = vmatpush2.msra.mxu1 %v171_v55 }
  0x7e   :  { %469 = vmatprep.subr.mxu0 %v162_v56  ;;  %540 = vmatprep.subr.mxu1 %v164_v57 }
  0x7f   :  { %470 = vmatpush2.msra.mxu0 %v161_v58  ;;  %541 = vmatpush2.msra.mxu1 %v163_v59 }
  0x80   :  { %471 = vmatprep.subr.mxu0 %v154_v60  ;;  %542 = vmatprep.subr.mxu1 %v156_v61 }
  0x81   :  { %472 = vmatpush2.msra.mxu0 %v153_v62  ;;  %543 = vmatpush2.msra.mxu1 %v155_v0 }
  0x82   :  { %473 = vmatprep.subr.mxu0 %v146_v2  ;;  %544 = vmatprep.subr.mxu1 %v148_v3 }
  0x83   :  { %474 = vmatpush2.msra.mxu0 %v145_v4  ;;  %475 = vmatprep.mubr.f32.mxu0 %v964_v63 }
  0x84   :  { %545 = vmatpush2.msra.mxu1 %v147_v5  ;;  %546 = vmatprep.mubr.f32.mxu1 %v964_v63 }
  0x85   :  { %476 = vmatmul.mubr.f32.vlgmr.msra.gmra.mxu0 %v972_v1  ;;  %547 = vmatmul.mubr.f32.vlgmr.msra.gmra.mxu1 %v972_v1 }
 0x103   :  { %v335_v6 = vpop.f32.mrf.mxu0  ;;  %v406_v7 = vpop.f32.mrf.mxu1 }
 0x104   :  { %553 = vst [vmem:[%s1392_s2] sm:$0xff] %v335_v6  ;;  %555 = vst [vmem:[%s1392_s2 + $0x10] sm:$0xff] %v406_v7 }
 0x105   :  { %v337_v8 = vpop.f32.mrf.mxu0  ;;  %v408_v9 = vpop.f32.mrf.mxu1 }
 0x106   :  { %554 = vst [vmem:[%s1392_s2 + $0x8] sm:$0xff] %v337_v8  ;;  %556 = vst [vmem:[%s1392_s2 + $0x18] sm:$0xff] %v408_v9 }
 0x145   :  { %v477_v63 = vpop.f32.mrf.mxu0  ;;  %v548_v1 = vpop.f32.mrf.mxu1 }
 0x146   :  { %557 = vst [vmem:[%s1392_s2 + $0x20] sm:$0xff] %v477_v63  ;;  %559 = vst [vmem:[%s1392_s2 + $0x30] sm:$0xff] %v548_v1 }
 0x147   :  { %v479_v10 = vpop.f32.mrf.mxu0  ;;  %v550_v11 = vpop.f32.mrf.mxu1 }
 0x148   :  { %558 = vst [vmem:[%s1392_s2 + $0x28] sm:$0xff] %v479_v10  ;;  %560 = vst [vmem:[%s1392_s2 + $0x38] sm:$0xff] %v550_v11 }

</bundles_post_ra>
